<compile_context>
chip_gen: v7x
topology: tpu7x:2x2x1
jax: 0.10.0
libtpu: 0.0.40
codegen_flags: <defaults>
</compile_context>

<pallas_src>
import functools

import jax
import jax.numpy as jnp
from jax.experimental import pallas as pl
from jax.experimental.pallas import tpu as pltpu

GEM_P = 6.5
GEM_EPS = 1e-6
BN_EPS = 1e-5
L2_EPS = 1e-12


# ---------------------------------------------------------------------------
# Stage 1: GeM part pooling + temporal (max + mean) pooling.
#   grid = (B, C // Cc); every step is independent -> both axes "parallel".
# ---------------------------------------------------------------------------
def _gem_pool_kernel(x_ref, pool_ref, feat_ref, *, t_len, c_chunk, num_parts):
    """x_ref    : (Cc*T, H*W)  lane-dense spatial slab of one sample / C-chunk
       pool_ref : (H*W, P)     pooling matrix (1/S on part p's spatial rows)
       feat_ref : (Cc, P)      GeM + temporal-pooled feature block
    """
    T, Cc, P = t_len, c_chunk, num_parts

    x = x_ref[...].astype(jnp.float32)          # bf16 input path: upcast in VMEM
    xc = jnp.maximum(x, GEM_EPS)                # clamp(min=eps)
    x2 = xc * xc
    x6 = (x2 * x2) * x2
    xp = x6 * jnp.sqrt(xc)                      # xc**6.5: 3 VPU muls + 1 EUP sqrt

    # Per-part spatial *mean* via one MXU matmul (replaces P unaligned
    # lane-slice reductions that saturated the XLU/VALU slots).
    m = jnp.dot(xp, pool_ref[...], preferred_element_type=jnp.float32)  # (Cc*T, P)
    pooled = jnp.exp(jnp.log(m) * (1.0 / GEM_P))                        # m**(1/p)

    # Temporal set pooling: max + mean over T, per channel / part.
    pooled = pooled.reshape(Cc, T, P)
    feat = jnp.max(pooled, axis=1) + jnp.mean(pooled, axis=1)           # (Cc, P)

    feat_ref[...] = feat                        # tiny (<1% of per-step traffic)


# ---------------------------------------------------------------------------
# Stage 2: tiny per-part tail -- FForward matmul, BatchNorm1d (batch stats),
#          L2 normalize, classifier.  grid = (P,), "parallel".
# ---------------------------------------------------------------------------
def _gem_tail_kernel(feat_ref, ff_ref, gamma_ref, beta_ref, fcn_ref,
                     out_ref, logit_ref):
    """feat_ref : (B, C)  lane-dense in C
       ff_ref   : (C, O)  FForward for this part
       gamma/beta: (1, O) BN affine for this part
       fcn_ref  : (O, K)  column-L2-normalized classifier for this part
       out_ref  : (B, O)  pre-BN outputs
       logit_ref: (B, K)  logits
    """
    feat = feat_ref[...]
    out = jnp.dot(feat, ff_ref[...], preferred_element_type=jnp.float32)   # (B, O)
    out_ref[...] = out.astype(out_ref.dtype)

    # BatchNorm1d, training-mode batch stats (biased variance).
    # TODO(synk): running-stat updates (stateful training side effect) not modeled.
    mu = jnp.mean(out, axis=0, keepdims=True)
    var = jnp.mean(jnp.square(out - mu), axis=0, keepdims=True)
    bn = gamma_ref[...] * (out - mu) * jax.lax.rsqrt(var + BN_EPS) + beta_ref[...]

    # F.normalize(bn_feat, dim=-1) via rsqrt (no full-width vdiv).
    ss = jnp.sum(bn * bn, axis=-1, keepdims=True)
    bn = bn * jax.lax.rsqrt(jnp.maximum(ss, L2_EPS * L2_EPS))

    logit_ref[...] = jnp.dot(
        bn, fcn_ref[...], preferred_element_type=jnp.float32).astype(logit_ref.dtype)


def _pick_c_chunk(C, T, HW, in_itemsize=4, budget_bytes=12 << 20):
    """Largest channel chunk whose *real* per-step VMEM footprint fits the
    budget: 2x double-buffered input block (input dtype) + ~3x the block in
    f32 temporaries (upcast x / xc / xp stay live through the pooling matmul),
    independent of the input dtype.  Sublane rule: (Cc*T) % 8 == 0 for 4-byte
    inputs, % 16 for 2-byte (bf16 packs 16 rows/vreg), unless the chunk covers
    all channels."""
    sub = 8 if in_itemsize >= 4 else 16
    chosen = None
    for cc in range(1, C + 1):
        if C % cc:
            continue
        if cc != C and (cc * T) % sub != 0:
            continue
        elems = cc * T * HW
        footprint = 2 * elems * in_itemsize + 3 * elems * 4
        if footprint <= budget_bytes:
            chosen = cc
    if chosen is None:                      # nothing fits: smallest legal chunk
        for cc in range(1, C + 1):
            if C % cc == 0 and (cc == C or (cc * T) % sub == 0):
                chosen = cc
                break
    return chosen


def gem_head_forward(x, ff, gamma, beta, fc, *, num_parts, c_chunk=None,
                     chunk_budget_bytes=12 << 20):
    """x: [B, C, T, H, W] (f32 or bf16).  Returns (outputs [B,P,O], logits [B,P,K])."""
    B, C, T, H, W = x.shape
    P = num_parts
    assert H % P == 0, "H must be divisible by num_parts"
    Hp = H // P
    S = Hp * W
    HW = H * W
    O = ff.shape[-1]
    K = fc.shape[-1]
    assert ff.shape == (P, C, O) and fc.shape == (P, O, K)

    if c_chunk is None:
        c_chunk = _pick_c_chunk(C, T, HW, in_itemsize=x.dtype.itemsize,
                                budget_bytes=chunk_budget_bytes)
    Cc = c_chunk
    sub = 8 if x.dtype.itemsize >= 4 else 16
    assert C % Cc == 0, "c_chunk must divide the channel count"
    assert Cc == C or (Cc * T) % sub == 0, (
        "c_chunk * T must be a multiple of 8 (f32) / 16 (bf16) or cover all C")
    nC = C // Cc

    # Free reshape only -- no HBM transpose of the large activation tensor.
    x_r = x.reshape(B, C * T, HW)

    # (HW, P) pooling matrix: 1/S on the spatial rows belonging to part p.
    row_part = (jnp.arange(HW) // W) // Hp
    pool = (row_part[:, None] == jnp.arange(P)[None, :]).astype(jnp.float32) * (1.0 / S)

    gem_kernel = functools.partial(
        _gem_pool_kernel, t_len=T, c_chunk=Cc, num_parts=P)

    # ---------------- Stage 1: GeM stage over the full activation tensor ----
    feat4 = pl.pallas_call(
        gem_kernel,
        grid=(B, nC),
        in_specs=[
            # lane-dense (Cc*T, H*W) slab of one sample / channel chunk
            pl.BlockSpec((None, Cc * T, HW), lambda b, c: (b, c, 0)),
            # small pooling matrix: fetched once, resident
            pl.BlockSpec((HW, P), lambda b, c: (0, 0)),
        ],
        out_specs=pl.BlockSpec((None, None, Cc, P), lambda b, c: (c, b, 0, 0)),
        out_shape=jax.ShapeDtypeStruct((nC, B, Cc, P), jnp.float32),
        compiler_params=pltpu.CompilerParams(
            dimension_semantics=("parallel", "parallel")),
    )(x_r, pool)

    # Tiny re-layout of the pooled features for the tail: (P, B, C), lane-dense C.
    feat_pbc = jnp.transpose(feat4, (3, 1, 0, 2)).reshape(P, B, C)

    # F.normalize(fc1d, dim=1) is batch-independent: hoisted out of the kernel.
    fc32 = fc.astype(jnp.float32)
    fc_ss = jnp.sum(fc32 * fc32, axis=1, keepdims=True)
    fcn = fc32 * jax.lax.rsqrt(jnp.maximum(fc_ss, L2_EPS * L2_EPS))

    gamma3 = gamma.reshape(P, 1, O).astype(jnp.float32)
    beta3 = beta.reshape(P, 1, O).astype(jnp.float32)

    # ---------------- Stage 2: tiny per-part tail ---------------------------
    out_pbo, logit_pbk = pl.pallas_call(
        _gem_tail_kernel,
        grid=(P,),
        in_specs=[
            pl.BlockSpec((None, B, C), lambda p: (p, 0, 0)),
            pl.BlockSpec((None, C, O), lambda p: (p, 0, 0)),
            pl.BlockSpec((None, 1, O), lambda p: (p, 0, 0)),
            pl.BlockSpec((None, 1, O), lambda p: (p, 0, 0)),
            pl.BlockSpec((None, O, K), lambda p: (p, 0, 0)),
        ],
        out_specs=(
            pl.BlockSpec((None, B, O), lambda p: (p, 0, 0)),
            pl.BlockSpec((None, B, K), lambda p: (p, 0, 0)),
        ),
        out_shape=(
            jax.ShapeDtypeStruct((P, B, O), jnp.float32),
            jax.ShapeDtypeStruct((P, B, K), jnp.float32),
        ),
        compiler_params=pltpu.CompilerParams(dimension_semantics=("parallel",)),
    )(feat_pbc, ff.astype(jnp.float32), gamma3, beta3, fcn)

    # tiny (P*B*{O,K}) transposes back to PyTorch's [B, P, *] convention
    return jnp.transpose(out_pbo, (1, 0, 2)), jnp.transpose(logit_pbk, (1, 0, 2))


# ---------------------------------------------------------------------------
# Pure-jnp reference mirroring the PyTorch module (self-test only).
# ---------------------------------------------------------------------------
def _gem_head_reference(x, ff, gamma, beta, fc, *, num_parts):
    B, C, T, H, W = x.shape
    P = num_parts
    hp = jax.lax.Precision.HIGHEST
    S = (H // P) * W
    xr = jnp.maximum(x.reshape(B, C, T, P, S).astype(jnp.float32), GEM_EPS)
    pooled = jnp.mean(xr ** GEM_P, axis=-1) ** (1.0 / GEM_P)           # (B,C,T,P)
    feat = jnp.max(pooled, axis=2) + jnp.mean(pooled, axis=2)          # (B,C,P)
    feat = jnp.transpose(feat, (2, 0, 1))                              # (P,B,C)
    outputs = jnp.einsum('pbc,pco->pbo', feat, ff, precision=hp)       # (P,B,O)
    mu = jnp.mean(outputs, axis=1, keepdims=True)
    var = jnp.mean((outputs - mu) ** 2, axis=1, keepdims=True)
    bn = gamma[:, None, :] * (outputs - mu) / jnp.sqrt(var + BN_EPS) + beta[:, None, :]
    bn = bn / jnp.maximum(jnp.linalg.norm(bn, axis=-1, keepdims=True), L2_EPS)
    w = fc / jnp.maximum(jnp.linalg.norm(fc, axis=1, keepdims=True), L2_EPS)
    logits = jnp.einsum('pbo,pok->pbk', bn, w, precision=hp)           # (P,B,K)
    return jnp.transpose(outputs, (1, 0, 2)), jnp.transpose(logits, (1, 0, 2))


def _xavier_uniform(key, shape):
    # PyTorch xavier_uniform_ on a 3-D tensor [d0, d1, d2]:
    #   fan_in = d1 * d2, fan_out = d0 * d2
    d0, d1, d2 = shape
    fan_in, fan_out = d1 * d2, d0 * d2
    bound = (6.0 / (fan_in + fan_out)) ** 0.5
    return jax.random.uniform(key, shape, jnp.float32, -bound, bound)


if __name__ == "__main__":
    # Small shapes consistent with the module's [B C T H W] input.
    B, C, T, H, W = 2, 8, 4, 16, 8
    num_parts = num_bins = 4          # GeMPartMapping parts == num_bins
    out_channels = 16
    num_classes = 8

    key = jax.random.PRNGKey(0)
    kx, kf, kc = jax.random.split(key, 3)

    x = jax.random.normal(kx, (B, C, T, H, W), jnp.float32)
    ff = _xavier_uniform(kf, (num_bins, C, out_channels))              # FForward
    fc = _xavier_uniform(kc, (num_bins, out_channels, num_classes))    # fc1d
    gamma = jnp.ones((num_bins, out_channels), jnp.float32)            # BN weight
    beta = jnp.zeros((num_bins, out_channels), jnp.float32)            # BN bias

    outputs, logits = gem_head_forward(
        x, ff, gamma, beta, fc, num_parts=num_parts,
        c_chunk=4)   # 2 channel chunks -> exercises the chunked (B, nC) grid
    jax.block_until_ready((outputs, logits))

    assert outputs.shape == (B, num_bins, out_channels)
    assert logits.shape == (B, num_bins, num_classes)

    ref_out, ref_log = _gem_head_reference(x, ff, gamma, beta, fc,
                                           num_parts=num_parts)
    assert jnp.allclose(outputs, ref_out, rtol=2e-2, atol=2e-2)
    # BatchNorm at batch=2 can amplify tiny rounding differences when the two
    # batch entries nearly tie on a feature, so the logits check stays loose.
    assert jnp.allclose(logits, ref_log, rtol=1e-1, atol=1e-1)
    assert bool(jnp.isfinite(logits).all())
    print("KERNEL_OK")
</pallas_src>

<mosaic_0001>
module attributes {stable_mosaic.version = 11 : i64} {
  func.func @_gem_pool_kernel(%arg0: i32, %arg1: i32, %arg2: memref<1x16x128xf32, #tpu.memory_space<vmem>>, %arg3: memref<128x4xf32, #tpu.memory_space<vmem>>, %arg4: memref<1x1x4x4xf32, #tpu.memory_space<vmem>>) attributes {dimension_semantics = [#tpu.dimension_semantics<parallel>, #tpu.dimension_semantics<parallel>], iteration_bounds = array<i64: 2, 2>, scalar_prefetch = 0 : i64, scratch_operands = 0 : i64, tpu.core_type = #tpu.core_type<tc>, window_params = [{transform_indices = @transform_0, window_bounds = array<i64: 1, 16, 128>}, {pipeline_mode = #tpu.pipeline_mode<synchronous>, transform_indices = @transform_1, window_bounds = array<i64: 128, 4>}, {transform_indices = @transform_2, window_bounds = array<i64: 1, 1, 4, 4>}]} {
    %c0 = arith.constant 0 : index
    %c0_0 = arith.constant 0 : index
    %c0_1 = arith.constant 0 : index
    %0 = vector.load %arg2[%c0, %c0_0, %c0_1] : memref<1x16x128xf32, #tpu.memory_space<vmem>>, vector<1x16x128xf32>
    %1 = vector.shape_cast %0 : vector<1x16x128xf32> to vector<16x128xf32>
    %cst = arith.constant 9.99999997E-7 : f32
    %2 = vector.broadcast %cst : f32 to vector<16x128xf32>
    %3 = arith.maximumf %1, %2 : vector<16x128xf32>
    %4 = arith.mulf %3, %3 : vector<16x128xf32>
    %5 = arith.mulf %4, %4 : vector<16x128xf32>
    %6 = arith.mulf %5, %4 : vector<16x128xf32>
    %7 = math.sqrt %3 : vector<16x128xf32>
    %8 = arith.mulf %6, %7 : vector<16x128xf32>
    %c0_2 = arith.constant 0 : index
    %c0_3 = arith.constant 0 : index
    %9 = vector.load %arg3[%c0_2, %c0_3] : memref<128x4xf32, #tpu.memory_space<vmem>>, vector<128x4xf32>
    %cst_4 = arith.constant dense<0.000000e+00> : vector<16x4xf32>
    %10 = tpu.matmul %8, %9, %cst_4 {dimension_numbers = #tpu.dot_dimension_numbers<[1], [0], [0], [1], [0, 0, 1, 1], [], []>} : vector<16x128xf32>, vector<128x4xf32>, vector<16x4xf32> -> vector<16x4xf32>
    %11 = math.log %10 : vector<16x4xf32>
    %cst_5 = arith.constant 0.15384616 : f32
    %12 = vector.broadcast %cst_5 : f32 to vector<16x4xf32>
    %13 = arith.mulf %11, %12 : vector<16x4xf32>
    %14 = math.exp %13 : vector<16x4xf32>
    %15 = vector.shape_cast %14 : vector<16x4xf32> to vector<4x4x4xf32>
    %cst_6 = arith.constant dense<0xFF800000> : vector<4x4xf32>
    %16 = vector.multi_reduction <maximumf>, %15, %cst_6 [1] : vector<4x4x4xf32> to vector<4x4xf32>
    %cst_7 = arith.constant dense<0.000000e+00> : vector<4x4xf32>
    %17 = vector.multi_reduction <add>, %15, %cst_7 [1] : vector<4x4x4xf32> to vector<4x4xf32>
    %cst_8 = arith.constant 4.000000e+00 : f32
    %18 = vector.broadcast %cst_8 : f32 to vector<4x4xf32>
    %19 = arith.divf %17, %18 : vector<4x4xf32>
    %20 = arith.addf %16, %19 : vector<4x4xf32>
    %c0_9 = arith.constant 0 : index
    %c0_10 = arith.constant 0 : index
    %c0_11 = arith.constant 0 : index
    %c0_12 = arith.constant 0 : index
    %21 = vector.load %arg4[%c0_9, %c0_10, %c0_11, %c0_12] : memref<1x1x4x4xf32, #tpu.memory_space<vmem>>, vector<1x1x4x4xf32>
    %22 = vector.shape_cast %21 : vector<1x1x4x4xf32> to vector<4x4xf32>
    %23 = vector.shape_cast %20 : vector<4x4xf32> to vector<1x1x4x4xf32>
    tpu.vector_store %arg4[%c0_9, %c0_10, %c0_11, %c0_12], %23 {strides = array<i32>} : memref<1x1x4x4xf32, #tpu.memory_space<vmem>>, vector<1x1x4x4xf32>,
    return
  }
  func.func @transform_0(%arg0: i32, %arg1: i32) -> (i32, i32, i32) {
    %c0_i32 = arith.constant 0 : i32
    %c0_i32_0 = arith.constant 0 : i32
    return %arg0, %arg1, %c0_i32 : i32, i32, i32
  }
  func.func @transform_1(%arg0: i32, %arg1: i32) -> (i32, i32) {
    %c0_i32 = arith.constant 0 : i32
    %c0_i32_0 = arith.constant 0 : i32
    %c0_i32_1 = arith.constant 0 : i32
    return %c0_i32, %c0_i32_0 : i32, i32
  }
  func.func @transform_2(%arg0: i32, %arg1: i32) -> (i32, i32, i32, i32) {
    %c0_i32 = arith.constant 0 : i32
    %c0_i32_0 = arith.constant 0 : i32
    %c0_i32_1 = arith.constant 0 : i32
    return %arg1, %arg0, %c0_i32, %c0_i32_0 : i32, i32, i32, i32
  }
}

</mosaic_0001>

<bundles_post_ra>
// kernel: tpu_custom_call.1
= control target key start
LH: loop header
LB: loop body
LE: loop exit
PB: predicated region body
PF: predicated region fallthrough
CT: control target
= control target key end

     0   :  { %7 = vsyncpa [#allocation3], 0  ;;  %s975_s0 = inlined_call_operand.vmem [shape: f32[2,32,128], index: 0, kind: input, shape index: {}]   ;;  %s976_s1 = inlined_call_operand.vmem [shape: f32[128,4], index: 1, kind: input, shape index: {}]   ;;  %s977_s2 = inlined_call_operand.hbm [shape: f32[2,2,4,4], index: 2, kind: output, shape index: {}]  }
   0x1   :  { %9 = vsyncpa [#allocation3 + $0x1], 0  ;;  %s771_s9 = smov 0   ;;  %s773_s10 = smov 0  }
   0x2   :  { %s775_s11 = smov 0   ;;  %s777_s12 = smov 0  }
   0x3   :  { %s779_s13 = smov 0   ;;  %s781_s14 = smov 0  }
   0x4   :  { %s783_s15 = smov 0   ;;  %s785_s16 = smov 0  }
   0x5 LB: > { %s477_s17 = sadd.s32 4294967295, %s753_s16   ;;  %s478_s18 = sadd.s32 4294967294, %s753_s16   ;;  %s753_s16 = sphi %s785_s16, %s15_s16   ;;  %s749_s15 = sphi %s783_s15, %s986_s15   ;;  %s745_s14 = sphi %s781_s14, %s985_s14   ;;  %s741_s13 = sphi %s779_s13, %s984_s13   ;;  %s737_s12 = sphi %s777_s12, %s983_s12   ;;  %s733_s11 = sphi %s775_s11, %s982_s11   ;;  %s729_s10 = sphi %s773_s10, %s981_s10   ;;  %s725_s9 = sphi %s771_s9, %s980_s9  }
   0x6   : > { %s24_s19 = sadd.s32 1, %s745_s14  ;;  %s27_s20 = sadd.s32 1, %s749_s15 }
   0x7   : > { %p25_p0 = scmp.ge.s32.totalorder %s24_s19, 2  ;;  %p95_p1 = scmp.ne.s32.totalorder %s733_s11, %s729_s10 }
   0x8   : > { %p96_p2 = scmp.eq.s32.totalorder %s477_s17, 3  ;;  %p101_p5 = scmp.ne.s32.totalorder %s729_s10, %s725_s9 }
   0x9   : > { %s988_s19 = smov (%p25_p0, %s24_s19), 0  ;;  %s990_s20 = smov (!%p25_p0, %s27_s20), %s749_s15 }
   0xa   : > { %s80_s21 = ssub.s32 %s745_s14, %s988_s19  ;;  %p822_p3 = por %p96_p2, %p95_p1 }
   0xb   : > { %p29_p4 = scmp.ge.s32.totalorder %s990_s20, 2  ;;  %p102_p6 = scmp.eq.s32.totalorder %s478_s18, 3 }
   0xc   : > { %p481_p7 = scmp.ge.s32.totalorder %s753_s16, 1  ;;  %p136_p9 = scmp.lt.s32.totalorder %s753_s16, 5 }
   0xd   : > { %s992_s20 = smov (%p29_p4, %s990_s20), 0  ;;  %p831_p8 = por %p102_p6, %p101_p5 }
   0xe   : > { %s81_s24 = ssub.s32 %s749_s15, %s992_s20  ;;  %s85_s25 = sadd.s32 1, %s733_s11 }
   0xf   : > { %s82_s26 = sor.u32 %s81_s24, %s80_s21  ;;  %p137_p10 = pnand %p481_p7, %p136_p9 }
  0x10   : > { %p83_p11 = scmp.eq.s32.totalorder %s82_s26, 0  ;;  %v198_v0 = vld [vmem:[%s976_s1] sm:$0xff] (!%p137_p10)  ;;  %v199_v1 = vld [vmem:[%s976_s1 + $0x8] sm:$0xff] (!%p137_p10)  ;;  %v200_v2 = vld [vmem:[%s976_s1 + $0x10] sm:$0xff] (!%p137_p10)  ;;  %s852_s6 = sshll.u32 (!%p137_p10), %s737_s12, 1  ;;  %vm305_vm4 = vcmask (!%p137_p10), 27648  }
  0x11   : > { %140 = sbr.rel (%p137_p10) target bundleno = 329 (0x149), region = 28  ;;  %p163_p12 = scmp.lt.s32.totalorder (!%p137_p10), %s741_s13, 1  ;;  %v544_v3 = vpack.c.bf16 (!%p137_p10), %v199_v1, %v198_v0  ;;  %v201_v4 = vld [vmem:[%s976_s1 + $0x18] sm:$0xff] (!%p137_p10)  ;;  %v202_v6 = vld [vmem:[%s976_s1 + $0x20] sm:$0xff] (!%p137_p10)  ;;  %v203_v7 = vld [vmem:[%s976_s1 + $0x28] sm:$0xff] (!%p137_p10)  ;;  %vm375_vm5 = vcmask (!%p137_p10), 1041409  }
  0x12   : > { %s840_s27 = scalar_select %p83_p11, %s733_s11, %s85_s25  }
  0x13   : > { %p165_p13 = scmp.lt.s32.totalorder (!%p137_p10), %s852_s6, 3  ;;  %v548_v5 = vpack.c.bf16 (!%p137_p10), %v201_v4, %v200_v2  ;;  %545 = vmatprep.subr.bf16.mxu0 (!%p137_p10), %v544_v3  ;;  %v552_v8 = vpack.c.bf16 (!%p137_p10), %v203_v7, %v202_v6  ;;  %v204_v9 = vld [vmem:[%s976_s1 + $0x30] sm:$0xff] (!%p137_p10)  ;;  %v205_v10 = vld [vmem:[%s976_s1 + $0x38] sm:$0xff] (!%p137_p10)  ;;  %v206_v16 = vld [vmem:[%s976_s1 + $0x40] sm:$0xff] (!%p137_p10)  ;;  %s159_s21 = sand.u32 (!%p137_p10), 1, %s729_s10   ;;  %vm377_vm6 = vcmask (!%p137_p10), 1042434  }
  0x14   : > { %547 = vmatpush3.bf16.msra.mxu0 (!%p137_p10), %v544_v3  ;;  %v556_v13 = vpack.c.bf16 (!%p137_p10), %v205_v10, %v204_v9  ;;  %v207_v17 = vld [vmem:[%s976_s1 + $0x48] sm:$0xff] (!%p137_p10)  ;;  %v208_v19 = vld [vmem:[%s976_s1 + $0x50] sm:$0xff] (!%p137_p10)  ;;  %v209_v20 = vld [vmem:[%s976_s1 + $0x58] sm:$0xff] (!%p137_p10)  ;;  %s911_s24 = sshll.u32 (!%p137_p10), %s159_s21, 2  ;;  %vm379_vm7 = vcmask (!%p137_p10), 1043459   ;;  %s384_s30 = scalar_lea.sflag (!%p137_p10), [#allocation3], %s159_s21 }
  0x15   : > { %549 = vmatprep.subr.bf16.mxu0 (!%p137_p10), %v548_v5  ;;  %v560_v18 = vpack.c.bf16 (!%p137_p10), %v207_v17, %v206_v16  ;;  %v564_v22 = vpack.c.bf16 (!%p137_p10), %v209_v20, %v208_v19  ;;  %v210_v23 = vld [vmem:[%s976_s1 + $0x60] sm:$0xff] (!%p137_p10)  ;;  %v211_v24 = vld [vmem:[%s976_s1 + $0x68] sm:$0xff] (!%p137_p10)  ;;  %v212_v31 = vld [vmem:[%s976_s1 + $0x70] sm:$0xff] (!%p137_p10)  ;;  %s755_s4 = smov (!%p137_p10), [#allocation2]  }
  0x16   : > { %v568_v28 = vpack.c.bf16 (!%p137_p10), %v211_v24, %v210_v23  ;;  %v213_v32 = vld [vmem:[%s976_s1 + $0x78] sm:$0xff] (!%p137_p10) }
  0x17   : > { %v572_v39 = vpack.c.bf16 (!%p137_p10), %v213_v32, %v212_v31 }
  0x18   : > { %s164_s12 = scalar_select %p163_p12, %s741_s13, 1  ;;  %551 = vmatpush3.bf16.msra.mxu0 %v548_v5 }
  0x19   : > { %s166_s25 = scalar_select %p165_p13, %s852_s6, 3  ;;  %553 = vmatprep.subr.bf16.mxu0 %v552_v8 }
  0x1a   : > { %s484_s26 = sshll.u32 %s164_s12, 2  ;;  %s395_s12 = sadd.s32 %s741_s13, %s852_s6 }
  0x1b   : > { %s168_s28 = sadd.s32 %s484_s26, %s166_s25  ;;  %s488_s25 = sshll.u32 %s395_s12, 6 }
  0x1c   : > { %s485_s5 = sshll.u32 %s168_s28, 3  ;;  %555 = vmatpush3.bf16.msra.mxu0 %v552_v8  ;;  %s161_s26 = scalar_lea.vmem [#allocation2], %s911_s24 }
  0x1d   : > { %s170_s17 = scalar_lea.vmem %s975_s0, %s485_s5  ;;  %557 = vmatprep.subr.bf16.mxu0 %v556_v13  ;;  %s399_s28 = sshll.u32 %s161_s26, 4  ;;  %s921_s28 = int_to_ptr.vmem [resolvable:$true] %s399_s28 }
  0x1e   : > { %v172_v11 = vld [vmem:[%s170_s17] sm:$0xff]  ;;  %v173_v12 = vld [vmem:[%s170_s17 + $0x8] sm:$0xff]  ;;  %s919_s6 = scalar_lea.hbm %s977_s2, %s488_s25  ;;  %s659_s3 = scalar_lea.vmem %s921_s28, 64 }
  0x1f   : > { %v174_v14 = vmax.f32 %v172_v11, 1e-06  ;;  %v175_v15 = vmax.f32 %v173_v12, 1e-06  ;;  %p660_p0 = scmp.ne.s32.totalorder %s921_s28, %s659_s3  ;;  %s663_s5 = sshll.u32 %s755_s4, 4  ;;  %s664_s5 = int_to_ptr.vmem [resolvable:$false] %s663_s5 }
  0x20   : > { %559 = vmatpush3.bf16.msra.mxu0 %v556_v13  ;;  %s665_s7 = scalar_lea.vmem %s664_s5, 128  ;;  %p666_p4 = scmp.lt.s32.totalorder %s921_s28, %s664_s5 }
  0x21   : > { %647 = vrsqrt.f32 %v174_v14  ;;  %v176_v21 = vmul.f32 %v174_v14, %v174_v14  ;;  %561 = vmatprep.subr.bf16.mxu0 %v560_v18  ;;  %v177_v26 = vmul.f32 %v175_v15, %v175_v15  ;;  %vm184_vm0 = vcmp.eq.f32.partialorder %v174_v14, inf  ;;  %p661_p1 = pnand %p660_p0, %p822_p3  ;;  %p667_p5 = scmp.lt.s32.totalorder %s665_s7, %s659_s3 }
  0x22   : > { %649 = vrsqrt.f32 %v175_v15  ;;  %v187_v29 = vand.u32 2147483648, %v174_v14  ;;  %vm186_vm1 = vcmp.eq.f32.partialorder %v174_v14, 0.0  ;;  %vm191_vm2 = vcmp.eq.f32.partialorder %v175_v15, inf }
  0x23   : > { %v178_v25 = vmul.f32 %v176_v21, %v176_v21  ;;  %v179_v35 = vmul.f32 %v177_v26, %v177_v26  ;;  %v194_v38 = vand.u32 2147483648, %v175_v15  ;;  %vm193_vm3 = vcmp.eq.f32.partialorder %v175_v15, 0.0  ;;  %p662_p2 = pneg %p661_p1  ;;  %p668_p6 = por %p667_p5, %p666_p4 }
  0x24   : > { %563 = vmatpush3.bf16.msra.mxu0 %v560_v18 }
  0x25   : > { %565 = vmatprep.subr.bf16.mxu0 %v564_v22  ;;  %v180_v33 = vmul.f32 %v178_v25, %v176_v21  ;;  %v181_v43 = vmul.f32 %v179_v35, %v177_v26  ;;  %p669_p7 = pnand %p668_p6, %p662_p2 }
  0x28   : > { %567 = vmatpush3.bf16.msra.mxu0 %v564_v22 }
  0x29   : > { %569 = vmatprep.subr.bf16.mxu0 %v568_v28 }
  0x2b   : > { %v648_v27 = vpop.eup %647 }
  0x2c   : > { %v650_v30 = vpop.eup %649  ;;  %v183_v34 = vmul.f32 %v648_v27, %v174_v14  ;;  %571 = vmatpush3.bf16.msra.mxu0 %v568_v28 }
  0x2d   : > { %v190_v36 = vmul.f32 %v650_v30, %v175_v15  ;;  %573 = vmatprep.subr.bf16.mxu0 %v572_v39 }
  0x2e   : > { %v185_v37 = vsel %vm184_vm0, %v174_v14, %v183_v34 }
  0x2f   : > { %v188_v40 = vsel %vm186_vm1, %v187_v29, %v185_v37  ;;  %v192_v41 = vsel %vm191_vm2, %v175_v15, %v190_v36 }
  0x30   : > { %v196_v42 = vmul.f32 %v188_v40, %v180_v33  ;;  %v195_v44 = vsel %vm193_vm3, %v194_v38, %v192_v41  ;;  %575 = vmatpush3.bf16.msra.mxu0 %v572_v39 }
  0x31   : > { %v197_v45 = vmul.f32 %v195_v44, %v181_v43 }
  0x32   : > { %541 = vmatprep.mubr.f32.mxu0 %v196_v42 }
  0x33   : > { %542 = vmatmul.mubr.f32.vlgmr.msra.gmra.mrb[0].mxu0 %v197_v45 }
 0x106   : > { %v543_v46 = vpop.f32.mrb[0].mxu0 }
 0x107   : > { %651 = vlog2.f32 %v543_v46  ;;  %v280_v47 = vpop.f32.mrb[1].mxu0 }
 0x108   : > { %653 = vlog2.f32 %v280_v47 }
 0x111   : > { %v652_v48 = vpop.eup %651 }
 0x112   : > { %v654_v49 = vpop.eup %653  ;;  %v292_v50 = vmul.f32 0.6931472, %v652_v48 }
 0x113   : > { %v290_v51 = vmul.f32 0.6931472, %v654_v49 }
 0x114   : > { %v294_v52 = vmul.f32 0.15384616, %v292_v50 }
 0x115   : > { %v293_v53 = vmul.f32 0.15384616, %v290_v51 }
 0x116   : > { %v297_v54 = vmul.f32 1.442695, %v294_v52 }
 0x117   : > { %v295_v55 = vmul.f32 1.442695, %v293_v53 }
 0x118   : > { %655 = vpow2.f32 %v297_v54 }
 0x119   : > { %657 = vpow2.f32 %v295_v55 }
 0x122   : > { %v656_v56 = vpop.eup %655 }
 0x123   : > { %v658_v57 = vpop.eup %657  ;;  %v302_v58 = vcombine.high %v656_v56, %v656_v56  ;;  %v320_v59 = vsel %vm305_vm4, %v656_v56, -inf  ;;  %v348_v60 = vsel %vm305_vm4, %v656_v56, 0.0 }
 0x124   : > { %v301_v61 = vcombine.high %v658_v57, %v658_v57  ;;  %v306_v62 = vsel %vm305_vm4, %v658_v57, -inf  ;;  %v321_v63 = vrot.slane %v320_v59, 4  ;;  %v334_v0 = vsel %vm305_vm4, %v658_v57, 0.0 }
 0x125   : > { %v307_v1 = vrot.slane %v306_v62, 4  ;;  %v327_v2 = vsel %vm305_vm4, %v302_v58, -inf  ;;  %v335_v3 = vrot.slane %v334_v0, 4  ;;  %v349_v4 = vrot.slane %v348_v60, 4 }
 0x126   : > { %v313_v5 = vsel %vm305_vm4, %v301_v61, -inf  ;;  %v322_v6 = vmax.f32 %v320_v59, %v321_v63  ;;  %v328_v7 = vrot.slane %v327_v2, 4  ;;  %v341_v8 = vsel %vm305_vm4, %v301_v61, 0.0 }
 0x127   : > { %v308_v9 = vmax.f32 %v306_v62, %v307_v1  ;;  %v314_v10 = vrot.slane %v313_v5, 4  ;;  %v336_v11 = vadd.f32 %v335_v3, %v334_v0  ;;  %v342_v12 = vrot.slane %v341_v8, 4 }
 0x128   : > { %v323_v13 = vrot.slane %v322_v6, 2  ;;  %v329_v14 = vmax.f32 %v327_v2, %v328_v7  ;;  %v350_v15 = vadd.f32 %v349_v4, %v348_v60  ;;  %v355_v16 = vsel %vm305_vm4, %v302_v58, 0.0 }
 0x129   : > { %v309_v17 = vrot.slane %v308_v9, 2  ;;  %v315_v18 = vmax.f32 %v313_v5, %v314_v10  ;;  %v337_v19 = vrot.slane %v336_v11, 2  ;;  %v343_v20 = vadd.f32 %v342_v12, %v341_v8 }
 0x12a   : > { %v330_v21 = vrot.slane %v329_v14, 2  ;;  %v351_v22 = vrot.slane %v350_v15, 2  ;;  %v356_v23 = vrot.slane %v355_v16, 4  ;;  %v324_v28 = vmax.f32 %v322_v6, %v323_v13 }
 0x12b   : > { %v310_v24 = vmax.f32 %v308_v9, %v309_v17  ;;  %v316_v25 = vrot.slane %v315_v18, 2  ;;  %v338_v26 = vadd.f32 %v337_v19, %v336_v11  ;;  %v344_v27 = vrot.slane %v343_v20, 2 }
 0x12c   : > { %v352_v29 = vadd.f32 %v351_v22, %v350_v15  ;;  %v357_v30 = vadd.f32 %v356_v23, %v355_v16  ;;  %v331_v34 = vmax.f32 %v329_v14, %v330_v21  ;;  %v325_v41 = vrot.slane %v324_v28, 1 }
 0x12d   : > { %v317_v31 = vmax.f32 %v315_v18, %v316_v25  ;;  %v339_v32 = vrot.slane %v338_v26, 1  ;;  %v345_v33 = vadd.f32 %v344_v27, %v343_v20  ;;  %v311_v37 = vrot.slane %v310_v24, 1 }
 0x12e   : > { %v353_v35 = vrot.slane %v352_v29, 1  ;;  %v358_v36 = vrot.slane %v357_v30, 2  ;;  %v332_v46 = vrot.slane %v331_v34, 1  ;;  %v326_v52 = vmax.f32 %v324_v28, %v325_v41 }
 0x12f   : > { %v318_v38 = vrot.slane %v317_v31, 1  ;;  %v340_v39 = vadd.f32 %v339_v32, %v338_v26  ;;  %v346_v40 = vrot.slane %v345_v33, 1  ;;  %v312_v49 = vmax.f32 %v310_v24, %v311_v37 }
 0x130   : > { %v354_v42 = vadd.f32 %v353_v35, %v352_v29  ;;  %v359_v43 = vadd.f32 %v358_v36, %v357_v30  ;;  %v333_v56 = vmax.f32 %v331_v34, %v332_v46 }
 0x131   : > { %v347_v44 = vadd.f32 %v346_v40, %v345_v33  ;;  %v363_v45 = vmul.f32 0.25, %v340_v39  ;;  %v319_v50 = vmax.f32 %v317_v31, %v318_v38 }
 0x132   : > { %v360_v47 = vrot.slane %v359_v43, 1  ;;  %v365_v48 = vmul.f32 0.25, %v354_v42 }
 0x133   : > { %v364_v51 = vmul.f32 0.25, %v347_v44  ;;  %v367_v54 = vadd.f32 %v363_v45, %v312_v49 }
 0x134   : > { %v361_v53 = vadd.f32 %v360_v47, %v359_v43  ;;  %v369_v58 = vadd.f32 %v365_v48, %v326_v52 }
 0x135   : > { %v368_v55 = vadd.f32 %v364_v51, %v319_v50 }
 0x136   : > { %v366_v57 = vmul.f32 0.25, %v361_v53 }
 0x137   : > { %v376_v59 = vsel %vm375_vm5, %v368_v55, %v367_v54 }
 0x138   : > { %v370_v60 = vadd.f32 %v366_v57, %v333_v56  ;;  %v378_v61 = vsel %vm377_vm6, %v369_v58, %v376_v59 }
 0x13a   : > { %v380_v62 = vsel %vm379_vm7, %v370_v60, %v378_v61 }
 0x13b   : > { %382 = vst.msk [vmem:[%s161_s26] sm:$0xf] %vm305_vm4, %v380_v62 }
 0x13c   : > { %672 = shalt.err (!%p669_p7)
}
 0x13d   : > { %s673_s8 = scalar_lea.hbm %s919_s6, 64  ;;  %s677_s21 = scalar_lea.hbm %s977_s2, 256 }
 0x13e   : > { %p674_p9 = scmp.ne.s32.totalorder %s919_s6, %s673_s8  ;;  %p678_p12 = scmp.lt.u32.totalorder %s919_s6, %s977_s2 }
 0x13f   : > { %p679_p13 = scmp.lt.u32.totalorder %s677_s21, %s673_s8  ;;  %p681_p1 = scmp.lt.u32.totalorder %s673_s8, %s919_s6 }
 0x140   : > { %p675_p10 = pnand %p674_p9, %p822_p3 }
 0x141   : > { %p680_p0 = por %p679_p13, %p678_p12 }
 0x142   : > { %p676_p11 = pneg %p675_p10 }
 0x143   : > { %p682_p2 = por %p681_p1, %p680_p0 }
 0x145   : > { %p683_p4 = pnand %p682_p2, %p676_p11 }
 0x147   : > { %686 = shalt.err (!%p683_p4)
}
 0x148   : > { %576 = dma.vmem_to_hbm [thread:$0]  (%p822_p3), %s921_s28, 64, %s919_s6, %s384_s30  }
 0x149 PF: > { %p582_p5 = scmp.ge.s32.totalorder %s753_s16, 2  ;;  %s411_s25 = sand.u32 1, %s725_s9  }
 0x14a   : > { %s412_s26 = scalar_lea.sflag [#allocation3], %s411_s25 }
 0x14b   : > { %p579_p6 = pnand %p582_p5, %p831_p8 }
 0x14d   : > { %720 = dma.done.wait (!%p579_p6), %s412_s26, 64  }
 0x14e   : > { %722 = vsyncadd (!%p579_p6), %s412_s26, 4294967232  ;;  %s15_s16 = sadd.s32 1, %s753_s16   ;;  %s980_s9 = smov %s729_s10 }
 0x14f   : > { %p12_p7 = scmp.ge.s32.totalorder %s15_s16, 6   ;;  %s981_s10 = smov %s733_s11 }
 0x150   : > { %s982_s11 = smov %s840_s27  ;;  %s983_s12 = smov %s745_s14 }
 0x151   : > { %s984_s13 = smov %s749_s15  ;;  %s985_s14 = smov %s988_s19 }
 0x152   : > { %s986_s15 = smov %s992_s20  ;;  %14 = sbr.rel (!%p12_p7) target bundleno = 5 (0x5), region = 63 }
 0x159   :  { %417 = vsyncpa [#allocation3], 1 }
 0x15a   :  { %419 = vsyncpa [#allocation3 + $0x1], 1 }

</bundles_post_ra>
